<compile_context>
chip_gen: v7x
topology: tpu7x:2x2x1
jax: 0.10.0
libtpu: 0.0.40
codegen_flags: <defaults>
</compile_context>

<pallas_src>
from functools import partial

import jax
import jax.numpy as jnp
from jax.experimental import pallas as pl
from jax.experimental.pallas import tpu as pltpu


def make_divisible(v, divisor=8, min_value=None, round_limit=0.9):
    min_value = min_value or divisor
    new_v = max(min_value, int(v + divisor / 2) // divisor * divisor)
    if new_v < round_limit * v:
        new_v += divisor
    return new_v


# --------------------------------------------------------------------------
# Kernels
# --------------------------------------------------------------------------
def _pool_kernel(x_ref, mean_ref, *, inv_hw):
    """Accumulate per-channel spatial sums into a resident (1, C, 1) block."""
    h = pl.program_id(1)

    @pl.when(h == 0)
    def _init():
        mean_ref[...] = jnp.zeros_like(mean_ref)

    x = x_ref[...].astype(jnp.float32)                       # (1, C, hw_tile)
    mean_ref[...] += jnp.sum(x, axis=-1, keepdims=True)      # (1, C, 1)

    @pl.when(h == pl.num_programs(1) - 1)
    def _finalize():
        mean_ref[...] = mean_ref[...] * inv_hw               # sum -> mean


def _fc_gate_kernel(p_ref, w1t_ref, b1_ref, w2t_ref, b2_ref, gate_ref):
    """gate = sigmoid(relu(p @ w1.T + b1) @ w2.T + b2), batched over B."""
    p = p_ref[...]                                           # (B, C) f32
    y1 = jnp.dot(p, w1t_ref[...],
                 preferred_element_type=jnp.float32) + b1_ref[...]   # (B, RD)
    y1 = jnp.maximum(y1, 0.0)
    y2 = jnp.dot(y1, w2t_ref[...],
                 preferred_element_type=jnp.float32) + b2_ref[...]   # (B, C)
    gate_ref[...] = jax.nn.sigmoid(y2)


def _excite_kernel(x_ref, gate_ref, o_ref):
    """out = x * gate, gate broadcast across the spatial (lane) axis."""
    x = x_ref[...].astype(jnp.float32)                       # (1, C, hw_tile)
    o_ref[...] = (x * gate_ref[...]).astype(o_ref.dtype)


# --------------------------------------------------------------------------
# Wrapper
# --------------------------------------------------------------------------
def _choose_hw_tile(HW, C, max_tile_bytes=2 * 1024 * 1024):
    """Largest lane-dense (multiple-of-128) spatial tile dividing H*W that
    keeps one (C, hw_tile) float32 buffer under max_tile_bytes."""
    if HW % 128 != 0:
        # TODO(synk): ragged spatial sizes (e.g. 7x7=49) would benefit from a
        # (B, HW, C) channels-on-lanes layout; fall back to one full block.
        return HW
    cap = max(128, (max_tile_bytes // (4 * C)) // 128 * 128)
    t = min(HW, cap)
    while HW % t != 0:
        t -= 128
    return t


def se_module_pallas(x, w1, b1, w2, b2, *, hw_tile=None):
    """x: (B, C, H, W) float32/bfloat16.  w1: (RD, C), b1: (RD,),
    w2: (C, RD), b2: (C,)  (PyTorch Conv2d 1x1 weights, squeezed).
    Returns (B, C, H, W) in x.dtype."""
    B, C, H, W = x.shape
    RD = w1.shape[0]
    HW = H * W

    if hw_tile is None:
        hw_tile = _choose_hw_tile(HW, C)
    assert HW % hw_tile == 0, "hw_tile must divide H*W"
    n_hw = HW // hw_tile

    x_flat = x.reshape(B, C, HW)

    # ---- pass 1: global average pool -> (B, C, 1) float32 ------------------
    pooled = pl.pallas_call(
        partial(_pool_kernel, inv_hw=1.0 / float(HW)),
        out_shape=jax.ShapeDtypeStruct((B, C, 1), jnp.float32),
        grid_spec=pltpu.PrefetchScalarGridSpec(
            num_scalar_prefetch=0,
            grid=(B, n_hw),
            in_specs=[pl.BlockSpec((1, C, hw_tile), lambda b, h: (b, 0, h))],
            out_specs=pl.BlockSpec((1, C, 1), lambda b, h: (b, 0, 0)),
        ),
        compiler_params=pltpu.CompilerParams(
            dimension_semantics=("parallel", "arbitrary")),
    )(x_flat)

    # ---- pass 1.5: fc1 -> relu -> fc2 -> sigmoid on the (B, C) pooled mat ---
    gate = pl.pallas_call(
        _fc_gate_kernel,
        out_shape=jax.ShapeDtypeStruct((B, C), jnp.float32),
    )(pooled.reshape(B, C),
      jnp.transpose(w1).astype(jnp.float32),      # (C, RD)
      b1.reshape(1, RD).astype(jnp.float32),      # lane-major bias
      jnp.transpose(w2).astype(jnp.float32),      # (RD, C)
      b2.reshape(1, C).astype(jnp.float32))

    # ---- pass 2: channel-wise gating (fully parallel grid) ------------------
    out_flat = pl.pallas_call(
        _excite_kernel,
        out_shape=jax.ShapeDtypeStruct((B, C, HW), x.dtype),
        grid_spec=pltpu.PrefetchScalarGridSpec(
            num_scalar_prefetch=0,
            grid=(B, n_hw),
            in_specs=[
                pl.BlockSpec((1, C, hw_tile), lambda b, h: (b, 0, h)),
                pl.BlockSpec((1, C, 1), lambda b, h: (b, 0, 0)),
            ],
            out_specs=pl.BlockSpec((1, C, hw_tile), lambda b, h: (b, 0, h)),
        ),
        compiler_params=pltpu.CompilerParams(
            dimension_semantics=("parallel", "parallel")),
    )(x_flat, gate.reshape(B, C, 1))

    return out_flat.reshape(B, C, H, W)


# --------------------------------------------------------------------------
# Pure-JAX reference matching the PyTorch forward
# --------------------------------------------------------------------------
def se_module_ref(x, w1, b1, w2, b2):
    xf = x.astype(jnp.float32)
    x_se = jnp.mean(xf, axis=(2, 3), keepdims=True)                  # (B,C,1,1)
    x_se = jnp.einsum('rc,bcij->brij', w1, x_se) + b1[None, :, None, None]
    x_se = jnp.maximum(x_se, 0.0)
    x_se = jnp.einsum('cr,brij->bcij', w2, x_se) + b2[None, :, None, None]
    return xf * jax.nn.sigmoid(x_se)


if __name__ == "__main__":
    B, C, H, W = 2, 4, 16, 16
    rd_ratio = 1.0 / 16
    RD = make_divisible(C * rd_ratio, 8, round_limit=0.0)   # -> 8

    key = jax.random.PRNGKey(0)
    kx, k1, kb1, k2, kb2 = jax.random.split(key, 5)
    x = jax.random.normal(kx, (B, C, H, W), dtype=jnp.float32)
    # fc1: Conv2d(C, RD, 1, bias=True) ; fc2: Conv2d(RD, C, 1, bias=True)
    w1 = jax.random.normal(k1, (RD, C), dtype=jnp.float32) * 0.1
    b1 = jax.random.normal(kb1, (RD,), dtype=jnp.float32) * 0.1
    w2 = jax.random.normal(k2, (C, RD), dtype=jnp.float32) * 0.1
    b2 = jax.random.normal(kb2, (C,), dtype=jnp.float32) * 0.1

    ref = se_module_ref(x, w1, b1, w2, b2)

    # f32, multi-tile spatial reduction path (hw_tile=128 -> 2 HW tiles).
    out = jax.block_until_ready(se_module_pallas(x, w1, b1, w2, b2, hw_tile=128))
    assert out.shape == (B, C, H, W)
    assert jnp.allclose(out, ref, atol=1e-5, rtol=1e-5), "mismatch (tiled f32)"

    # f32, auto tile selection (single spatial tile path).
    out2 = jax.block_until_ready(se_module_pallas(x, w1, b1, w2, b2))
    assert jnp.allclose(out2, ref, atol=1e-5, rtol=1e-5), "mismatch (auto f32)"

    # bf16 I/O path (f32 accumulation / FC / sigmoid inside the kernels).
    x_bf16 = x.astype(jnp.bfloat16)
    out_bf16 = jax.block_until_ready(
        se_module_pallas(x_bf16, w1, b1, w2, b2, hw_tile=128))
    assert out_bf16.dtype == jnp.bfloat16
    ref_bf16 = se_module_ref(x_bf16, w1, b1, w2, b2)
    assert jnp.allclose(out_bf16.astype(jnp.float32), ref_bf16,
                        atol=5e-2, rtol=5e-2), "mismatch (bf16)"

    print("KERNEL_OK")
</pallas_src>

<mosaic_0001>
module attributes {stable_mosaic.version = 11 : i64} {
  func.func @_pool_kernel(%arg0: i32, %arg1: i32, %arg2: memref<1x4x128xf32, #tpu.memory_space<vmem>>, %arg3: memref<1x4x1xf32, #tpu.memory_space<vmem>>) attributes {dimension_semantics = [#tpu.dimension_semantics<parallel>, #tpu.dimension_semantics<arbitrary>], iteration_bounds = array<i64: 2, 2>, scalar_prefetch = 0 : i64, scratch_operands = 0 : i64, tpu.core_type = #tpu.core_type<tc>, window_params = [{transform_indices = @transform_0, window_bounds = array<i64: 1, 4, 128>}, {transform_indices = @transform_1, window_bounds = array<i64: 1, 4, 1>}]} {
    %c0_i32 = arith.constant 0 : i32
    %0 = arith.cmpi eq, %arg1, %c0_i32 : i32
    %1 = arith.extui %0 : i1 to i32
    %c0_i32_0 = arith.constant 0 : i32
    %2 = arith.cmpi ne, %1, %c0_i32_0 : i32
    scf.if %2 {
      %cst_10 = arith.constant 0.000000e+00 : f32
      %12 = vector.broadcast %cst_10 : f32 to vector<1x4x1xf32>
      %c0_11 = arith.constant 0 : index
      %c0_12 = arith.constant 0 : index
      %c0_13 = arith.constant 0 : index
      %13 = vector.load %arg3[%c0_11, %c0_12, %c0_13] : memref<1x4x1xf32, #tpu.memory_space<vmem>>, vector<1x4x1xf32>
      tpu.vector_store %arg3[%c0_11, %c0_12, %c0_13], %12 {strides = array<i32>} : memref<1x4x1xf32, #tpu.memory_space<vmem>>, vector<1x4x1xf32>,
    } else {
    }
    %c0 = arith.constant 0 : index
    %c0_1 = arith.constant 0 : index
    %c0_2 = arith.constant 0 : index
    %3 = vector.load %arg2[%c0, %c0_1, %c0_2] : memref<1x4x128xf32, #tpu.memory_space<vmem>>, vector<1x4x128xf32>
    %c0_3 = arith.constant 0 : index
    %c0_4 = arith.constant 0 : index
    %c0_5 = arith.constant 0 : index
    %4 = vector.load %arg3[%c0_3, %c0_4, %c0_5] : memref<1x4x1xf32, #tpu.memory_space<vmem>>, vector<1x4x1xf32>
    %cst = arith.constant dense<0.000000e+00> : vector<1x4xf32>
    %5 = vector.multi_reduction <add>, %3, %cst [2] : vector<1x4x128xf32> to vector<1x4xf32>
    %6 = vector.shape_cast %5 : vector<1x4xf32> to vector<1x4x1xf32>
    %7 = arith.addf %4, %6 : vector<1x4x1xf32>
    %c0_6 = arith.constant 0 : index
    %c0_7 = arith.constant 0 : index
    %c0_8 = arith.constant 0 : index
    %8 = vector.load %arg3[%c0_6, %c0_7, %c0_8] : memref<1x4x1xf32, #tpu.memory_space<vmem>>, vector<1x4x1xf32>
    tpu.vector_store %arg3[%c0_6, %c0_7, %c0_8], %7 {strides = array<i32>} : memref<1x4x1xf32, #tpu.memory_space<vmem>>, vector<1x4x1xf32>,
    %c1_i32 = arith.constant 1 : i32
    %9 = arith.cmpi eq, %arg1, %c1_i32 : i32
    %10 = arith.extui %9 : i1 to i32
    %c0_i32_9 = arith.constant 0 : i32
    %11 = arith.cmpi ne, %10, %c0_i32_9 : i32
    scf.if %11 {
      %c0_10 = arith.constant 0 : index
      %c0_11 = arith.constant 0 : index
      %c0_12 = arith.constant 0 : index
      %12 = vector.load %arg3[%c0_10, %c0_11, %c0_12] : memref<1x4x1xf32, #tpu.memory_space<vmem>>, vector<1x4x1xf32>
      %cst_13 = arith.constant 3.906250e-03 : f32
      %13 = vector.broadcast %cst_13 : f32 to vector<1x4x1xf32>
      %14 = arith.mulf %12, %13 : vector<1x4x1xf32>
      %c0_14 = arith.constant 0 : index
      %c0_15 = arith.constant 0 : index
      %c0_16 = arith.constant 0 : index
      %15 = vector.load %arg3[%c0_14, %c0_15, %c0_16] : memref<1x4x1xf32, #tpu.memory_space<vmem>>, vector<1x4x1xf32>
      tpu.vector_store %arg3[%c0_14, %c0_15, %c0_16], %14 {strides = array<i32>} : memref<1x4x1xf32, #tpu.memory_space<vmem>>, vector<1x4x1xf32>,
    } else {
    }
    return
  }
  func.func @transform_0(%arg0: i32, %arg1: i32) -> (i32, i32, i32) {
    %c0_i32 = arith.constant 0 : i32
    %c0_i32_0 = arith.constant 0 : i32
    return %arg0, %c0_i32, %arg1 : i32, i32, i32
  }
  func.func @transform_1(%arg0: i32, %arg1: i32) -> (i32, i32, i32) {
    %c0_i32 = arith.constant 0 : i32
    %c0_i32_0 = arith.constant 0 : i32
    %c0_i32_1 = arith.constant 0 : i32
    return %arg0, %c0_i32, %c0_i32_0 : i32, i32, i32
  }
}

</mosaic_0001>

<bundles_post_ra>
// kernel: tpu_custom_call.1
= control target key start
LH: loop header
LB: loop body
LE: loop exit
PB: predicated region body
PF: predicated region fallthrough
CT: control target
= control target key end

     0   :  { %6 = vsyncpa [#allocation3], 0  ;;  %s596_s0 = inlined_call_operand.hbm [shape: f32[2,4,256], index: 0, kind: input, shape index: {}]   ;;  %s597_s1 = inlined_call_operand.vmem [shape: f32[2,4,1], index: 1, kind: output, shape index: {}]  }
   0x1   :  { %8 = vsyncpa [#allocation3 + $0x1], 0  ;;  %s444_s6 = smov 0   ;;  %s446_s7 = smov 0  }
   0x2   :  { %s448_s8 = smov 0   ;;  %s450_s9 = smov 0  }
   0x3   :  { %s452_s10 = smov 0   ;;  %s454_s11 = smov 0  }
   0x4   :  { %s456_s12 = smov 0   ;;  %s458_s13 = smov 0  }
   0x5 LB: > { %s248_s14 = sadd.s32 4294967295, %s430_s13   ;;  %s23_s15 = sadd.s32 1, %s422_s11  ;;  %s430_s13 = sphi %s458_s13, %s14_s13   ;;  %s426_s12 = sphi %s456_s12, %s609_s12   ;;  %s422_s11 = sphi %s454_s11, %s608_s11   ;;  %s418_s10 = sphi %s452_s10, %s607_s10   ;;  %s414_s9 = sphi %s450_s9, %s606_s9   ;;  %s410_s8 = sphi %s448_s8, %s605_s8   ;;  %s406_s7 = sphi %s446_s7, %s604_s7   ;;  %s402_s6 = sphi %s444_s6, %s603_s6  }
   0x6   : > { %p24_p0 = scmp.ge.s32.totalorder %s23_s15, 2  ;;  %s26_s16 = sadd.s32 1, %s426_s12 }
   0x7   : > { %s35_s17 = sadd.s32 1, %s410_s8  ;;  %p42_p1 = scmp.ne.s32.totalorder %s410_s8, %s406_s7 }
   0x8   : > { %s611_s15 = smov (%p24_p0, %s23_s15), 0  ;;  %s613_s16 = smov (!%p24_p0, %s26_s16), %s426_s12 }
   0x9   : > { %s31_s18 = ssub.s32 %s422_s11, %s611_s15  ;;  %p43_p2 = scmp.eq.s32.totalorder %s430_s13, 0 }
   0xa   : > { %p28_p3 = scmp.ge.s32.totalorder %s613_s16, 2  ;;  %p48_p4 = scmp.ne.s32.totalorder %s406_s7, %s402_s6 }
   0xb   : > { %p495_p5 = por %p43_p2, %p42_p1  ;;  %p49_p6 = scmp.eq.s32.totalorder %s248_s14, 0 }
   0xc   : > { %s615_s16 = smov (%p28_p3, %s613_s16), 0  ;;  %p268_p8 = scmp.lt.s32.totalorder %s430_s13, 4 }
   0xd   : > { %p501_p7 = por %p49_p6, %p48_p4  ;;  %s30_s21 = ssub.s32 %s426_s12, %s615_s16 }
   0xe   : > { %s32_s22 = sor.u32 %s31_s18, %s30_s21  ;;  %s98_s23 = sand.u32 1, %s410_s8  }
   0xf   : > { %p33_p9 = scmp.eq.s32.totalorder %s32_s22, 0  ;;  %s252_s24 = sshll.u32 %s98_s23, 2 }
  0x10   : > { %s253_s25 = sshll.u32 %s426_s12, 1  ;;  %s102_s29 = scalar_lea.vmem [#allocation2], %s252_s24 }
  0x11   : > { %s511_s26 = scalar_select %p33_p9, %s410_s8, %s35_s17  }
  0x12   : > { %s107_s27 = sadd.s32 %s422_s11, %s253_s25  ;;  %s111_s30 = sshll.u32 %s102_s29, 4  ;;  %s519_s30 = int_to_ptr.vmem [resolvable:$true] %s111_s30 }
  0x13   : > { %s254_s28 = sshll.u32 %s107_s27, 6  ;;  %p525_p10 = pnand %p268_p8, %p495_p5 }
  0x14   : > { %s517_s4 = scalar_lea.hbm %s596_s0, %s254_s28  ;;  %s99_s6 = scalar_lea.sflag [#allocation3], %s98_s23 }
  0x15   : > { %s334_s14 = scalar_lea.hbm %s517_s4, 64  ;;  %p336_p0 = pneg %p525_p10 }
  0x16   : > { %p335_p13 = scmp.ne.s32.totalorder %s517_s4, %s334_s14  ;;  %s339_s19 = scalar_lea.hbm %s596_s0, 256 }
  0x17   : > { %p340_p3 = scmp.lt.u32.totalorder %s517_s4, %s596_s0  ;;  %p341_p4 = scmp.lt.u32.totalorder %s339_s19, %s334_s14 }
  0x18   : > { %p337_p1 = pnand %p336_p0, %p335_p13  ;;  %p343_p6 = scmp.lt.u32.totalorder %s334_s14, %s517_s4 }
  0x19   : > { %p342_p5 = por %p341_p4, %p340_p3 }
  0x1a   : > { %p338_p2 = pneg %p337_p1 }
  0x1b   : > { %p344_p8 = por %p343_p6, %p342_p5 }
  0x1d   : > { %p345_p9 = pnand %p344_p8, %p338_p2 }
  0x1f   : > { %348 = shalt.err (!%p345_p9)
}
  0x20   : > { %s349_s23 = scalar_lea.vmem %s519_s30, 64  ;;  %s432_s24 = smov [#allocation2]  }
  0x21   : > { %p350_p13 = scmp.ne.s32.totalorder %s519_s30, %s349_s23  ;;  %s354_s25 = sshll.u32 %s432_s24, 4  ;;  %s355_s25 = int_to_ptr.vmem [resolvable:$false] %s354_s25 }
  0x22   : > { %s356_s27 = scalar_lea.vmem %s355_s25, 128  ;;  %p357_p12 = scmp.lt.s32.totalorder %s519_s30, %s355_s25 }
  0x23   : > { %p352_p1 = pnand %p350_p13, %p336_p0  ;;  %p358_p3 = scmp.lt.s32.totalorder %s356_s27, %s349_s23 }
  0x25   : > { %p353_p11 = pneg %p352_p1  ;;  %p359_p4 = por %p358_p3, %p357_p12 }
  0x27   : > { %p360_p5 = pnand %p359_p4, %p353_p11 }
  0x29   : > { %363 = shalt.err (!%p360_p5)
}
  0x2a   : > { %267 = dma.hbm_to_vmem [thread:$0]  (!%p525_p10), %s517_s4, 64, %s519_s30, %s99_s6  }
  0x2b   : > { %p601_p2 = scmp.lt.s32.totalorder %s430_s13, 5  ;;  %p602_p6 = scmp.ge.s32.totalorder %s430_s13, 1 }
  0x2d   : > { %p117_p0 = pnand %p602_p6, %p601_p2 }
  0x2e   : > { %s122_s28 = sand.u32 (!%p117_p0), 1, %s406_s7  }
  0x2f   : > { %120 = sbr.rel (%p117_p0) target bundleno = 221 (0xdd), region = 24  ;;  %s256_s29 = sshll.u32 (!%p117_p0), %s122_s28, 2 }
  0x30   : > { %s123_s2 = scalar_lea.sflag (!%p117_p0), [#allocation3], %s122_s28  ;;  %s126_s3 = scalar_lea.vmem (!%p117_p0), [#allocation2], %s256_s29 }
  0x36   : > { %397 = dma.done.wait (%p501_p7), %s123_s2, 64  }
  0x37   : > { %399 = vsyncadd (%p501_p7), %s123_s2, 4294967232  ;;  %p144_p11 = scmp.lt.s32.totalorder %s418_s10, 1  ;;  %p258_p10 = scmp.ne.s32.totalorder %s414_s9, 0 }
  0x38   : > { %vm152_vm0 = vcmask (!%p258_p10), 3072   ;;  %v433_v0 = vmov (!%p258_p10), 0.0  }
  0x39   : > { %s617_s10 = smov (!%p144_p11, %s418_s10), 1  ;;  %151 = sbr.rel (%p258_p10) target bundleno = 64 (0x40), region = 32 }
  0x3a   : > { %s257_s30 = sshll.u32 %s617_s10, 2 }
  0x3b   : > { %s147_s6 = scalar_lea.vmem %s597_s1, %s257_s30 }
  0x3c   : > { %153 = vst.msk [vmem:[%s147_s6] sm:$0xf] (!%p258_p10), %vm152_vm0, %v433_v0 }
  0x40 PF: > { %v154_v1 = vld [vmem:[%s126_s3] sm:$0xf]  ;;  %vm156_vm1 = vcmask 1043456   ;;  %vm161_vm2 = vcmask 3072   ;;  %p259_p7 = scmp.ne.s32.totalorder %s414_s9, 1 }
  0x41   : > { %v157_v2 = vsel %vm156_vm1, %v154_v1, 0.0 }
  0x42   : > { %158 = vadd.xlane.f32.xlu0 %v157_v2 }
  0x43   : > { %v155_v3 = vld [vmem:[%s147_s6] sm:$0xf] }
  0xcc   : > { %166 = sbr.rel (%p259_p7) target bundleno = 221 (0xdd), region = 36 }
  0xcf   : > { %v159_v4 = vpop.xlane.xlu0 %158 }
  0xd0   : > { %v160_v5 = vadd.f32 %v159_v4, %v155_v3 }
  0xd2   : > { %162 = vst.msk [vmem:[%s147_s6] sm:$0xf] %vm161_vm2, %v160_v5 }
  0xd9   : > { %v167_v6 = vld [vmem:[%s147_s6] sm:$0xf] }
  0xda   : > { %v168_v7 = vmul.f32 0.00390625, %v167_v6 }
  0xdc   : > { %169 = vst.msk [vmem:[%s147_s6] sm:$0xf] %vm161_vm2, %v168_v7 }
  0xdd PF: > { %s14_s13 = sadd.s32 1, %s430_s13   ;;  %s603_s6 = smov %s406_s7 }
  0xde   : > { %p11_p12 = scmp.ge.s32.totalorder %s14_s13, 6   ;;  %s604_s7 = smov %s410_s8 }
  0xdf   : > { %s605_s8 = smov %s511_s26  ;;  %s606_s9 = smov %s422_s11 }
  0xe0   : > { %s607_s10 = smov %s426_s12  ;;  %s608_s11 = smov %s611_s15 }
  0xe1   : > { %s609_s12 = smov %s615_s16  ;;  %13 = sbr.rel (!%p11_p12) target bundleno = 5 (0x5), region = 72 }
  0xe8   :  { %189 = vsyncpa [#allocation3], 1 }
  0xe9   :  { %191 = vsyncpa [#allocation3 + $0x1], 1 }

</bundles_post_ra>
